<compile_context>
chip_gen: v5e
topology: v5e:2x2
jax: 0.10.0
libtpu: 0.0.40
codegen_flags: <defaults>
</compile_context>

<pallas_src>
import jax
import jax.numpy as jnp
from jax.experimental import pallas as pl
from jax.experimental.pallas import tpu as pltpu

# Module hyper-parameters (from Networks.py)
CONV_OUT4 = 128      # feature width after conv stack + global max pool
LINEAR_OUT = 512
LN_EPS = 1e-5

JNT_SLAB = 128       # lane-padded width of the (jnt_pos, jnt_goal) slab (2*jnt_dim <= 128)
OUT_PAD = 128        # lane-padded width of the actor output (jnt_dim <= 128)

# TODO(synk): `tau_max` is an undefined module-level global in Networks.py; treated as 1.0 here.
TAU_MAX = 1.0

_SELU_ALPHA = 1.6732632423543772
_SELU_SCALE = 1.0507009873554805


def _round_up(x, m):
    return (x + m - 1) // m * m


def _selu(x):
    return _SELU_SCALE * jnp.where(x > 0, x, _SELU_ALPHA * (jnp.exp(x) - 1.0))


def _layernorm(x, gamma, beta, eps=LN_EPS):
    mu = jnp.mean(x, axis=-1, keepdims=True)
    var = jnp.mean((x - mu) ** 2, axis=-1, keepdims=True)
    return (x - mu) * jax.lax.rsqrt(var + eps) * gamma + beta


def actor_head_kernel(
    feat_ref,         # (TB, 128)  pooled conv features
    jnt_ref,          # (TB, 128)  [jnt_pos | jnt_goal | zeros]
    g1_ref, b1n_ref,  # LayerNorm(128) weight / bias, (1, 128)
    wf_ref,           # (128, 512) Linear1 rows for the conv-feature block
    wj_ref,           # (128, 512) Linear1 rows for the jnt slab (zero-padded past 2*jnt_dim)
    b1_ref,           # (1, 512)
    g2_ref, b2n_ref,  # LayerNorm(512) weight / bias, (1, 512)
    w2_ref,           # (512, 128)  out-Linear weight, zero-padded past jnt_dim columns
    b2_ref,           # (1, 128)    out-Linear bias,   zero-padded past jnt_dim
    out_ref,          # (TB, 128)   lane-dense output tile
):
    f32 = jnp.float32

    # --- self.norm: LayerNorm(conv_out4) + SELU (dropout1 = identity) ---
    y = _selu(_layernorm(feat_ref[...], g1_ref[...], b1n_ref[...]))

    # --- self.linear: Linear(2*jnt_dim + 128, 512) as two full-lane K=128 MXU passes ---
    z = (
        jnp.dot(jnt_ref[...], wj_ref[...], preferred_element_type=f32)
        + jnp.dot(y, wf_ref[...], preferred_element_type=f32)
        + b1_ref[...]
    )
    h = _selu(_layernorm(z, g2_ref[...], b2n_ref[...]))   # dropout2 = identity

    # --- self.out: Linear(512, jnt_dim) padded to 128 output lanes, Tanh, * tau_max ---
    out_ref[...] = TAU_MAX * jnp.tanh(
        jnp.dot(h, w2_ref[...], preferred_element_type=f32) + b2_ref[...]
    )


def supervised_actor_head(feat, jnt_pos, jnt_goal, weights, packed_params, *, tile_b=1024):
    """Dense head of SupervisedActor.

    `weights` is accepted for signature parity with the PyTorch forward, which also
    ignores it.  Returns (B, jnt_dim) float32.
    """
    del weights  # unused, exactly as in the PyTorch forward
    B = feat.shape[0]
    J = jnt_pos.shape[1]
    assert 2 * J <= JNT_SLAB and J <= OUT_PAD, "jnt_dim too large for the padded slabs"

    feat = feat.astype(jnp.float32)
    jnt = jnp.concatenate([jnt_pos, jnt_goal], axis=1).astype(jnp.float32)
    jnt = jnp.pad(jnt, ((0, 0), (0, JNT_SLAB - 2 * J)))   # exact zeros -> no contraction effect

    # Batch tiling: TB rows per grid step (bounded VMEM, pipelined DMA); pad B up to a
    # multiple of TB.  Tiny batches collapse to a single (8,128)-padded tile.
    TB = min(tile_b, _round_up(B, 8))
    Bp = _round_up(B, TB)
    if Bp != B:
        feat = jnp.pad(feat, ((0, Bp - B), (0, 0)))
        jnt = jnp.pad(jnt, ((0, Bp - B), (0, 0)))

    p = packed_params

    def act_spec(width):
        return pl.BlockSpec((TB, width), lambda i: (i, 0))

    def pin_spec(shape):
        return pl.BlockSpec(shape, lambda i: (0,) * len(shape))

    out = pl.pallas_call(
        actor_head_kernel,
        out_shape=jax.ShapeDtypeStruct((Bp, OUT_PAD), jnp.float32),
        grid=(Bp // TB,),
        in_specs=[
            act_spec(CONV_OUT4),                      # feat
            act_spec(JNT_SLAB),                       # jnt slab
            pin_spec((1, CONV_OUT4)),                 # g1
            pin_spec((1, CONV_OUT4)),                 # b1n
            pin_spec((CONV_OUT4, LINEAR_OUT)),        # wf
            pin_spec((JNT_SLAB, LINEAR_OUT)),         # wj
            pin_spec((1, LINEAR_OUT)),                # b1
            pin_spec((1, LINEAR_OUT)),                # g2
            pin_spec((1, LINEAR_OUT)),                # b2n
            pin_spec((LINEAR_OUT, OUT_PAD)),          # w2 (padded)
            pin_spec((1, OUT_PAD)),                   # b2 (padded)
        ],
        out_specs=act_spec(OUT_PAD),
        compiler_params=pltpu.CompilerParams(
            dimension_semantics=("parallel",),        # shard batch tiles across TCs on v7x
            vmem_limit_bytes=32 * 1024 * 1024,
        ),
    )(feat, jnt, p["g1"], p["b1n"], p["wf"], p["wj"], p["b1"],
      p["g2"], p["b2n"], p["w2"], p["b2"])

    return out[:B, :J]


def init_params(key, jnt_dim):
    """Raw parameters (PyTorch-style: LN weight=1/bias=0, Linear uniform)."""
    d_in = CONV_OUT4 + 2 * jnt_dim
    k1, k2, k3, k4 = jax.random.split(key, 4)
    bound1 = 1.0 / jnp.sqrt(d_in)
    w1 = jax.random.uniform(k1, (d_in, LINEAR_OUT), jnp.float32, -bound1, bound1)
    b1 = jax.random.uniform(k2, (1, LINEAR_OUT), jnp.float32, -bound1, bound1)
    bound2 = 1.0 / jnp.sqrt(LINEAR_OUT)
    w2 = jax.random.uniform(k3, (LINEAR_OUT, jnt_dim), jnp.float32, -bound2, bound2)
    b2 = jax.random.uniform(k4, (1, jnt_dim), jnp.float32, -bound2, bound2)
    return dict(
        g1=jnp.ones((1, CONV_OUT4), jnp.float32),
        b1n=jnp.zeros((1, CONV_OUT4), jnp.float32),
        w1=w1, b1=b1,
        g2=jnp.ones((1, LINEAR_OUT), jnp.float32),
        b2n=jnp.zeros((1, LINEAR_OUT), jnp.float32),
        w2=w2, b2=b2,
    )


def pack_params(p, jnt_dim):
    """Split / zero-pad raw params into the lane-aligned layout the kernel expects."""
    j2 = 2 * jnt_dim
    # concat order in PyTorch is (jnt_pos, jnt_goal, feat): rows [0:2J] -> jnt, [2J:] -> feat
    wj = jnp.zeros((JNT_SLAB, LINEAR_OUT), jnp.float32).at[:j2].set(p["w1"][:j2])
    wf = p["w1"][j2:]
    w2p = jnp.zeros((LINEAR_OUT, OUT_PAD), jnp.float32).at[:, :jnt_dim].set(p["w2"])
    b2p = jnp.zeros((1, OUT_PAD), jnp.float32).at[:, :jnt_dim].set(p["b2"])
    return dict(
        g1=p["g1"], b1n=p["b1n"],
        wf=wf, wj=wj, b1=p["b1"],
        g2=p["g2"], b2n=p["b2n"],
        w2=w2p, b2=b2p,
    )


def supervised_actor_ref(feat, jnt_pos, jnt_goal, weights, p):
    """Pure-JAX reference (mirrors the PyTorch forward after the conv stack)."""
    del weights
    y = _selu(_layernorm(feat, p["g1"], p["b1n"]))
    z = jnp.concatenate([jnt_pos, jnt_goal, y], axis=1)
    h = _selu(_layernorm(z @ p["w1"] + p["b1"], p["g2"], p["b2n"]))
    return TAU_MAX * jnp.tanh(h @ p["w2"] + p["b2"])


if __name__ == "__main__":
    B = 2
    JNT_DIM = 5   # default jnt_dim in SupervisedActor.__init__

    key = jax.random.PRNGKey(0)
    k_feat, k_pos, k_goal, k_wts, k_par = jax.random.split(key, 5)

    conv_feat = jax.random.normal(k_feat, (B, CONV_OUT4), jnp.float32)
    jnt_pos = jax.random.normal(k_pos, (B, JNT_DIM), jnp.float32)
    jnt_goal = jax.random.normal(k_goal, (B, JNT_DIM), jnp.float32)
    weights = jax.random.normal(k_wts, (B, 3), jnp.float32)   # passed but unused by forward

    raw_params = init_params(k_par, JNT_DIM)
    packed_params = pack_params(raw_params, JNT_DIM)

    out = supervised_actor_head(conv_feat, jnt_pos, jnt_goal, weights, packed_params)
    out = jax.block_until_ready(out)

    ref = supervised_actor_ref(conv_feat, jnt_pos, jnt_goal, weights, raw_params)
    assert out.shape == (B, JNT_DIM), out.shape
    assert jnp.allclose(out, ref, atol=1e-4, rtol=1e-4), (out, ref)

    print("KERNEL_OK")
</pallas_src>

<mosaic_0001>
module attributes {stable_mosaic.version = 11 : i64} {
  func.func @actor_head_kernel(%arg0: i32, %arg1: memref<8x128xf32, #tpu.memory_space<vmem>>, %arg2: memref<8x128xf32, #tpu.memory_space<vmem>>, %arg3: memref<1x128xf32, #tpu.memory_space<vmem>>, %arg4: memref<1x128xf32, #tpu.memory_space<vmem>>, %arg5: memref<128x512xf32, #tpu.memory_space<vmem>>, %arg6: memref<128x512xf32, #tpu.memory_space<vmem>>, %arg7: memref<1x512xf32, #tpu.memory_space<vmem>>, %arg8: memref<1x512xf32, #tpu.memory_space<vmem>>, %arg9: memref<1x512xf32, #tpu.memory_space<vmem>>, %arg10: memref<512x128xf32, #tpu.memory_space<vmem>>, %arg11: memref<1x128xf32, #tpu.memory_space<vmem>>, %arg12: memref<8x128xf32, #tpu.memory_space<vmem>>) attributes {dimension_semantics = [#tpu.dimension_semantics<parallel>], iteration_bounds = array<i64: 1>, scalar_prefetch = 0 : i64, scratch_operands = 0 : i64, tpu.core_type = #tpu.core_type<tc>, window_params = [{transform_indices = @transform_0, window_bounds = array<i64: 8, 128>}, {transform_indices = @transform_1, window_bounds = array<i64: 8, 128>}, {pipeline_mode = #tpu.pipeline_mode<synchronous>, transform_indices = @transform_2, window_bounds = array<i64: 1, 128>}, {pipeline_mode = #tpu.pipeline_mode<synchronous>, transform_indices = @transform_3, window_bounds = array<i64: 1, 128>}, {pipeline_mode = #tpu.pipeline_mode<synchronous>, transform_indices = @transform_4, window_bounds = array<i64: 128, 512>}, {pipeline_mode = #tpu.pipeline_mode<synchronous>, transform_indices = @transform_5, window_bounds = array<i64: 128, 512>}, {pipeline_mode = #tpu.pipeline_mode<synchronous>, transform_indices = @transform_6, window_bounds = array<i64: 1, 512>}, {pipeline_mode = #tpu.pipeline_mode<synchronous>, transform_indices = @transform_7, window_bounds = array<i64: 1, 512>}, {pipeline_mode = #tpu.pipeline_mode<synchronous>, transform_indices = @transform_8, window_bounds = array<i64: 1, 512>}, {pipeline_mode = #tpu.pipeline_mode<synchronous>, transform_indices = @transform_9, window_bounds = array<i64: 512, 128>}, {pipeline_mode = #tpu.pipeline_mode<synchronous>, transform_indices = @transform_10, window_bounds = array<i64: 1, 128>}, {transform_indices = @transform_11, window_bounds = array<i64: 8, 128>}]} {
    %c0 = arith.constant 0 : index
    %c0_0 = arith.constant 0 : index
    %0 = vector.load %arg1[%c0, %c0_0] : memref<8x128xf32, #tpu.memory_space<vmem>>, vector<8x128xf32>
    %c0_1 = arith.constant 0 : index
    %c0_2 = arith.constant 0 : index
    %1 = vector.load %arg3[%c0_1, %c0_2] : memref<1x128xf32, #tpu.memory_space<vmem>>, vector<1x128xf32>
    %c0_3 = arith.constant 0 : index
    %c0_4 = arith.constant 0 : index
    %2 = vector.load %arg4[%c0_3, %c0_4] : memref<1x128xf32, #tpu.memory_space<vmem>>, vector<1x128xf32>
    %cst = arith.constant dense<0.000000e+00> : vector<8xf32>
    %3 = vector.multi_reduction <add>, %0, %cst [1] : vector<8x128xf32> to vector<8xf32>
    %4 = vector.shape_cast %3 : vector<8xf32> to vector<8x1xf32>
    %cst_5 = arith.constant 1.280000e+02 : f32
    %5 = vector.broadcast %cst_5 : f32 to vector<8x1xf32>
    %6 = arith.divf %4, %5 : vector<8x1xf32>
    %7 = vector.broadcast %6 : vector<8x1xf32> to vector<8x128xf32>
    %8 = arith.subf %0, %7 : vector<8x128xf32>
    %9 = arith.mulf %8, %8 : vector<8x128xf32>
    %cst_6 = arith.constant dense<0.000000e+00> : vector<8xf32>
    %10 = vector.multi_reduction <add>, %9, %cst_6 [1] : vector<8x128xf32> to vector<8xf32>
    %11 = vector.shape_cast %10 : vector<8xf32> to vector<8x1xf32>
    %cst_7 = arith.constant 1.280000e+02 : f32
    %12 = vector.broadcast %cst_7 : f32 to vector<8x1xf32>
    %13 = arith.divf %11, %12 : vector<8x1xf32>
    %14 = vector.broadcast %6 : vector<8x1xf32> to vector<8x128xf32>
    %15 = arith.subf %0, %14 : vector<8x128xf32>
    %cst_8 = arith.constant 9.99999974E-6 : f32
    %16 = vector.broadcast %cst_8 : f32 to vector<8x1xf32>
    %17 = arith.addf %13, %16 : vector<8x1xf32>
    %18 = math.rsqrt %17 : vector<8x1xf32>
    %19 = vector.broadcast %18 : vector<8x1xf32> to vector<8x128xf32>
    %20 = arith.mulf %15, %19 : vector<8x128xf32>
    %21 = vector.broadcast %1 : vector<1x128xf32> to vector<8x128xf32>
    %22 = arith.mulf %20, %21 : vector<8x128xf32>
    %23 = vector.broadcast %2 : vector<1x128xf32> to vector<8x128xf32>
    %24 = arith.addf %22, %23 : vector<8x128xf32>
    %cst_9 = arith.constant 0.000000e+00 : f32
    %25 = vector.broadcast %cst_9 : f32 to vector<8x128xf32>
    %26 = arith.cmpf ogt, %24, %25 : vector<8x128xf32>
    %27 = math.exp %24 : vector<8x128xf32>
    %cst_10 = arith.constant 1.000000e+00 : f32
    %28 = vector.broadcast %cst_10 : f32 to vector<8x128xf32>
    %29 = arith.subf %27, %28 : vector<8x128xf32>
    %cst_11 = arith.constant 1.67326319 : f32
    %30 = vector.broadcast %cst_11 : f32 to vector<8x128xf32>
    %31 = arith.mulf %30, %29 : vector<8x128xf32>
    %32 = arith.select %26, %24, %31 : vector<8x128xi1>, vector<8x128xf32>
    %cst_12 = arith.constant 1.05070102 : f32
    %33 = vector.broadcast %cst_12 : f32 to vector<8x128xf32>
    %34 = arith.mulf %33, %32 : vector<8x128xf32>
    %c0_13 = arith.constant 0 : index
    %c0_14 = arith.constant 0 : index
    %35 = vector.load %arg2[%c0_13, %c0_14] : memref<8x128xf32, #tpu.memory_space<vmem>>, vector<8x128xf32>
    %c0_15 = arith.constant 0 : index
    %c0_16 = arith.constant 0 : index
    %36 = vector.load %arg6[%c0_15, %c0_16] : memref<128x512xf32, #tpu.memory_space<vmem>>, vector<128x512xf32>
    %cst_17 = arith.constant dense<0.000000e+00> : vector<8x512xf32>
    %37 = tpu.matmul %35, %36, %cst_17 {dimension_numbers = #tpu.dot_dimension_numbers<[1], [0], [0], [1], [0, 0, 1, 1], [], []>} : vector<8x128xf32>, vector<128x512xf32>, vector<8x512xf32> -> vector<8x512xf32>
    %c0_18 = arith.constant 0 : index
    %c0_19 = arith.constant 0 : index
    %38 = vector.load %arg5[%c0_18, %c0_19] : memref<128x512xf32, #tpu.memory_space<vmem>>, vector<128x512xf32>
    %cst_20 = arith.constant dense<0.000000e+00> : vector<8x512xf32>
    %39 = tpu.matmul %34, %38, %cst_20 {dimension_numbers = #tpu.dot_dimension_numbers<[1], [0], [0], [1], [0, 0, 1, 1], [], []>} : vector<8x128xf32>, vector<128x512xf32>, vector<8x512xf32> -> vector<8x512xf32>
    %40 = arith.addf %37, %39 : vector<8x512xf32>
    %c0_21 = arith.constant 0 : index
    %c0_22 = arith.constant 0 : index
    %41 = vector.load %arg7[%c0_21, %c0_22] : memref<1x512xf32, #tpu.memory_space<vmem>>, vector<1x512xf32>
    %42 = vector.broadcast %41 : vector<1x512xf32> to vector<8x512xf32>
    %43 = arith.addf %40, %42 : vector<8x512xf32>
    %c0_23 = arith.constant 0 : index
    %c0_24 = arith.constant 0 : index
    %44 = vector.load %arg8[%c0_23, %c0_24] : memref<1x512xf32, #tpu.memory_space<vmem>>, vector<1x512xf32>
    %c0_25 = arith.constant 0 : index
    %c0_26 = arith.constant 0 : index
    %45 = vector.load %arg9[%c0_25, %c0_26] : memref<1x512xf32, #tpu.memory_space<vmem>>, vector<1x512xf32>
    %cst_27 = arith.constant dense<0.000000e+00> : vector<8xf32>
    %46 = vector.multi_reduction <add>, %43, %cst_27 [1] : vector<8x512xf32> to vector<8xf32>
    %47 = vector.shape_cast %46 : vector<8xf32> to vector<8x1xf32>
    %cst_28 = arith.constant 5.120000e+02 : f32
    %48 = vector.broadcast %cst_28 : f32 to vector<8x1xf32>
    %49 = arith.divf %47, %48 : vector<8x1xf32>
    %50 = vector.broadcast %49 : vector<8x1xf32> to vector<8x512xf32>
    %51 = arith.subf %43, %50 : vector<8x512xf32>
    %52 = arith.mulf %51, %51 : vector<8x512xf32>
    %cst_29 = arith.constant dense<0.000000e+00> : vector<8xf32>
    %53 = vector.multi_reduction <add>, %52, %cst_29 [1] : vector<8x512xf32> to vector<8xf32>
    %54 = vector.shape_cast %53 : vector<8xf32> to vector<8x1xf32>
    %cst_30 = arith.constant 5.120000e+02 : f32
    %55 = vector.broadcast %cst_30 : f32 to vector<8x1xf32>
    %56 = arith.divf %54, %55 : vector<8x1xf32>
    %57 = vector.broadcast %49 : vector<8x1xf32> to vector<8x512xf32>
    %58 = arith.subf %43, %57 : vector<8x512xf32>
    %cst_31 = arith.constant 9.99999974E-6 : f32
    %59 = vector.broadcast %cst_31 : f32 to vector<8x1xf32>
    %60 = arith.addf %56, %59 : vector<8x1xf32>
    %61 = math.rsqrt %60 : vector<8x1xf32>
    %62 = vector.broadcast %61 : vector<8x1xf32> to vector<8x512xf32>
    %63 = arith.mulf %58, %62 : vector<8x512xf32>
    %64 = vector.broadcast %44 : vector<1x512xf32> to vector<8x512xf32>
    %65 = arith.mulf %63, %64 : vector<8x512xf32>
    %66 = vector.broadcast %45 : vector<1x512xf32> to vector<8x512xf32>
    %67 = arith.addf %65, %66 : vector<8x512xf32>
    %cst_32 = arith.constant 0.000000e+00 : f32
    %68 = vector.broadcast %cst_32 : f32 to vector<8x512xf32>
    %69 = arith.cmpf ogt, %67, %68 : vector<8x512xf32>
    %70 = math.exp %67 : vector<8x512xf32>
    %cst_33 = arith.constant 1.000000e+00 : f32
    %71 = vector.broadcast %cst_33 : f32 to vector<8x512xf32>
    %72 = arith.subf %70, %71 : vector<8x512xf32>
    %cst_34 = arith.constant 1.67326319 : f32
    %73 = vector.broadcast %cst_34 : f32 to vector<8x512xf32>
    %74 = arith.mulf %73, %72 : vector<8x512xf32>
    %75 = arith.select %69, %67, %74 : vector<8x512xi1>, vector<8x512xf32>
    %cst_35 = arith.constant 1.05070102 : f32
    %76 = vector.broadcast %cst_35 : f32 to vector<8x512xf32>
    %77 = arith.mulf %76, %75 : vector<8x512xf32>
    %c0_36 = arith.constant 0 : index
    %c0_37 = arith.constant 0 : index
    %78 = vector.load %arg10[%c0_36, %c0_37] : memref<512x128xf32, #tpu.memory_space<vmem>>, vector<512x128xf32>
    %cst_38 = arith.constant dense<0.000000e+00> : vector<8x128xf32>
    %79 = tpu.matmul %77, %78, %cst_38 {dimension_numbers = #tpu.dot_dimension_numbers<[1], [0], [0], [1], [0, 0, 1, 1], [], []>} : vector<8x512xf32>, vector<512x128xf32>, vector<8x128xf32> -> vector<8x128xf32>
    %c0_39 = arith.constant 0 : index
    %c0_40 = arith.constant 0 : index
    %80 = vector.load %arg11[%c0_39, %c0_40] : memref<1x128xf32, #tpu.memory_space<vmem>>, vector<1x128xf32>
    %81 = vector.broadcast %80 : vector<1x128xf32> to vector<8x128xf32>
    %82 = arith.addf %79, %81 : vector<8x128xf32>
    %83 = math.tanh %82 : vector<8x128xf32>
    %cst_41 = arith.constant 1.000000e+00 : f32
    %84 = vector.broadcast %cst_41 : f32 to vector<8x128xf32>
    %85 = arith.mulf %84, %83 : vector<8x128xf32>
    %c0_42 = arith.constant 0 : index
    %c0_43 = arith.constant 0 : index
    %86 = vector.load %arg12[%c0_42, %c0_43] : memref<8x128xf32, #tpu.memory_space<vmem>>, vector<8x128xf32>
    tpu.vector_store %arg12[%c0_42, %c0_43], %85 {strides = array<i32>} : memref<8x128xf32, #tpu.memory_space<vmem>>, vector<8x128xf32>,
    return
  }
  func.func @transform_0(%arg0: i32) -> (i32, i32) {
    %c0_i32 = arith.constant 0 : i32
    %c0_i32_0 = arith.constant 0 : i32
    return %arg0, %c0_i32 : i32, i32
  }
  func.func @transform_1(%arg0: i32) -> (i32, i32) {
    %c0_i32 = arith.constant 0 : i32
    %c0_i32_0 = arith.constant 0 : i32
    return %arg0, %c0_i32 : i32, i32
  }
  func.func @transform_2(%arg0: i32) -> (i32, i32) {
    %c0_i32 = arith.constant 0 : i32
    %c0_i32_0 = arith.constant 0 : i32
    %c0_i32_1 = arith.constant 0 : i32
    return %c0_i32, %c0_i32_0 : i32, i32
  }
  func.func @transform_3(%arg0: i32) -> (i32, i32) {
    %c0_i32 = arith.constant 0 : i32
    %c0_i32_0 = arith.constant 0 : i32
    %c0_i32_1 = arith.constant 0 : i32
    return %c0_i32, %c0_i32_0 : i32, i32
  }
  func.func @transform_4(%arg0: i32) -> (i32, i32) {
    %c0_i32 = arith.constant 0 : i32
    %c0_i32_0 = arith.constant 0 : i32
    %c0_i32_1 = arith.constant 0 : i32
    return %c0_i32, %c0_i32_0 : i32, i32
  }
  func.func @transform_5(%arg0: i32) -> (i32, i32) {
    %c0_i32 = arith.constant 0 : i32
    %c0_i32_0 = arith.constant 0 : i32
    %c0_i32_1 = arith.constant 0 : i32
    return %c0_i32, %c0_i32_0 : i32, i32
  }
  func.func @transform_6(%arg0: i32) -> (i32, i32) {
    %c0_i32 = arith.constant 0 : i32
    %c0_i32_0 = arith.constant 0 : i32
    %c0_i32_1 = arith.constant 0 : i32
    return %c0_i32, %c0_i32_0 : i32, i32
  }
  func.func @transform_7(%arg0: i32) -> (i32, i32) {
    %c0_i32 = arith.constant 0 : i32
    %c0_i32_0 = arith.constant 0 : i32
    %c0_i32_1 = arith.constant 0 : i32
    return %c0_i32, %c0_i32_0 : i32, i32
  }
  func.func @transform_8(%arg0: i32) -> (i32, i32) {
    %c0_i32 = arith.constant 0 : i32
    %c0_i32_0 = arith.constant 0 : i32
    %c0_i32_1 = arith.constant 0 : i32
    return %c0_i32, %c0_i32_0 : i32, i32
  }
  func.func @transform_9(%arg0: i32) -> (i32, i32) {
    %c0_i32 = arith.constant 0 : i32
    %c0_i32_0 = arith.constant 0 : i32
    %c0_i32_1 = arith.constant 0 : i32
    return %c0_i32, %c0_i32_0 : i32, i32
  }
  func.func @transform_10(%arg0: i32) -> (i32, i32) {
    %c0_i32 = arith.constant 0 : i32
    %c0_i32_0 = arith.constant 0 : i32
    %c0_i32_1 = arith.constant 0 : i32
    return %c0_i32, %c0_i32_0 : i32, i32
  }
  func.func @transform_11(%arg0: i32) -> (i32, i32) {
    %c0_i32 = arith.constant 0 : i32
    %c0_i32_0 = arith.constant 0 : i32
    return %arg0, %c0_i32 : i32, i32
  }
}

</mosaic_0001>

<bundles_post_ra>
// kernel: tpu_custom_call.1
= control target key start
LH: loop header
LB: loop body
LE: loop exit
PB: predicated region body
PF: predicated region fallthrough
CT: control target
= control target key end

     0   :  { %16 = vsyncpa [#allocation3], 0  ;;  %s1197_s0 = inlined_call_operand.hbm [shape: f32[8,128], index: 0, kind: input, shape index: {}]   ;;  %s1198_s1 = inlined_call_operand.hbm [shape: f32[8,128], index: 1, kind: input, shape index: {}]   ;;  %s1199_s2 = inlined_call_operand.vmem [shape: f32[1,128], index: 2, kind: input, shape index: {}]   ;;  %s1200_s3 = inlined_call_operand.hbm [shape: f32[1,128], index: 3, kind: input, shape index: {}]   ;;  %s1201_s4 = inlined_call_operand.hbm [shape: f32[128,512], index: 4, kind: input, shape index: {}]   ;;  %s1202_s5 = inlined_call_operand.hbm [shape: f32[128,512], index: 5, kind: input, shape index: {}]   ;;  %s1203_s6 = inlined_call_operand.vmem [shape: f32[1,512], index: 6, kind: input, shape index: {}]   ;;  %s1204_s7 = inlined_call_operand.hbm [shape: f32[1,512], index: 7, kind: input, shape index: {}]   ;;  %s1205_s8 = inlined_call_operand.hbm [shape: f32[1,512], index: 8, kind: input, shape index: {}]   ;;  %s1206_s9 = inlined_call_operand.hbm [shape: f32[512,128], index: 9, kind: input, shape index: {}]   ;;  %s1207_s10 = inlined_call_operand.vmem [shape: f32[1,128], index: 10, kind: input, shape index: {}]   ;;  %s1208_s11 = inlined_call_operand.hbm [shape: f32[8,128], index: 11, kind: output, shape index: {}]  }
   0x1   :  { %17 = vsyncpa [#allocation6], 0 }
   0x2   :  { %18 = vsyncpa [#allocation9], 0 }
   0x3   :  { %19 = vsyncpa [#allocation12], 0 }
   0x4   :  { %20 = vsyncpa [#allocation15], 0  ;;  %s38_s19 = sshll.u32 %s1198_s1, 4  ;;  %s39_s19 = int_to_ptr.hbm [resolvable:$true] %s38_s19 }
   0x5   :  { %21 = vsyncpa [#allocation4], 0  ;;  %s1042_s20 = smov [#allocation5]   ;;  %s61_s24 = sshll.u32 %s1201_s4, 4  ;;  %s62_s24 = int_to_ptr.hbm [resolvable:$true] %s61_s24 }
   0x6   :  { %s40_s21 = sshll.u32 %s1042_s20, 4  ;;  %s1043_s25 = smov [#allocation8]   ;;  %s41_s21 = int_to_ptr.vmem [resolvable:$true] %s40_s21 }
   0x7   :  { %43 = dma.hbm_to_vmem [thread:$0]  %s39_s19, 128, %s41_s21, [#allocation6]  }
   0x8   :  { %s63_s26 = sshll.u32 %s1043_s25, 4  ;;  %s1044_s27 = smov 512   ;;  %s64_s26 = int_to_ptr.vmem [resolvable:$true] %s63_s26 }
   0x9   :  { %s1045_s28 = smov 32   ;;  %s90_s30 = sshll.u32 %s1204_s7, 4  ;;  %s91_s30 = int_to_ptr.hbm [resolvable:$true] %s90_s30 }
   0xa   :  { %69 = dma.hbm_to_vmem [thread:$0]  %s62_s24, 8192, %s64_s26, [#allocation9], %s1044_s27, %s1044_s27, %s1045_s28  }
   0xb   :  { %s1046_s12 = smov [#allocation11]   ;;  %s27_s15 = sshll.u32 %s1197_s0, 4  ;;  %s28_s15 = int_to_ptr.hbm [resolvable:$true] %s27_s15 }
   0xc   :  { %s92_s13 = sshll.u32 %s1046_s12, 4  ;;  %s1047_s16 = smov [#allocation2]   ;;  %s93_s13 = int_to_ptr.vmem [resolvable:$true] %s92_s13 }
   0xd   :  { %95 = dma.hbm_to_vmem [thread:$0]  %s91_s30, 64, %s93_s13, [#allocation12]  }
   0xe   :  { %s29_s17 = sshll.u32 %s1047_s16, 4  ;;  %s51_s20 = sshll.u32 %s1200_s3, 4  ;;  %s30_s17 = int_to_ptr.vmem [resolvable:$true] %s29_s17  ;;  %s52_s20 = int_to_ptr.hbm [resolvable:$true] %s51_s20 }
   0xf   :  { %32 = dma.hbm_to_vmem [thread:$0]  %s28_s15, 128, %s30_s17, [#allocation3]  }
  0x10   :  { %s74_s22 = sshll.u32 %s1202_s5, 4  ;;  %s1048_s23 = smov [#allocation7]   ;;  %s75_s22 = int_to_ptr.hbm [resolvable:$true] %s74_s22 }
  0x11   :  { %s53_s24 = sshll.u32 %s1048_s23, 4  ;;  %s1049_s0 = smov [#allocation10]   ;;  %s54_s24 = int_to_ptr.vmem [resolvable:$true] %s53_s24 }
  0x12   :  { %56 = dma.hbm_to_vmem [thread:$0]  %s52_s20, 16, %s54_s24, [#allocation6]  }
  0x13   :  { %s76_s25 = sshll.u32 %s1049_s0, 4  ;;  %s101_s29 = sshll.u32 %s1205_s8, 4  ;;  %s77_s25 = int_to_ptr.vmem [resolvable:$true] %s76_s25  ;;  %s102_s29 = int_to_ptr.hbm [resolvable:$true] %s101_s29 }
  0x14   :  { %82 = dma.hbm_to_vmem [thread:$0]  %s75_s22, 8192, %s77_s25, [#allocation9], %s1044_s27, %s1044_s27, %s1045_s28  }
  0x15   :  { %s111_s5 = sshll.u32 %s1206_s9, 4  ;;  %s1050_s12 = smov [#allocation13]   ;;  %s112_s5 = int_to_ptr.hbm [resolvable:$true] %s111_s5 }
  0x16   :  { %s103_s13 = sshll.u32 %s1050_s12, 4  ;;  %s1051_s4 = smov [#allocation14]   ;;  %s104_s13 = int_to_ptr.vmem [resolvable:$true] %s103_s13 }
  0x17   :  { %106 = dma.hbm_to_vmem [thread:$0]  %s102_s29, 64, %s104_s13, [#allocation12]  }
  0x18   :  { %s113_s14 = sshll.u32 %s1051_s4, 4  ;;  %s1052_s15 = smov 128   ;;  %s114_s14 = int_to_ptr.vmem [resolvable:$true] %s113_s14 }
  0x19   :  { %s1053_s8 = smov 8  }
  0x1a   :  { %119 = dma.hbm_to_vmem [thread:$0]  %s112_s5, 8192, %s114_s14, [#allocation15], %s1052_s15, %s1052_s15, %s1053_s8  }
  0x1b   :  { %1030 = dma.done.wait [#allocation3], 128  }
  0x1c   :  { %1031 = vsyncadd [#allocation3], 4294967168 }
  0x1d   :  { %1032 = dma.done.wait [#allocation6], 144  }
  0x1e   :  { %1033 = vsyncadd [#allocation6], 4294967152 }
  0x1f   :  { %1034 = dma.done.wait [#allocation9], 16384  }
  0x20   :  { %1035 = vsyncadd [#allocation9], 4294950912 }
  0x21   :  { %1036 = dma.done.wait [#allocation12], 128  }
  0x22   :  { %1037 = vsyncadd [#allocation12], 4294967168 }
  0x23   :  { %1038 = dma.done.wait [#allocation15], 8192  }
  0x24   :  { %1039 = vsyncadd [#allocation15], 4294959104  ;;  %v154_v0 = vld [vmem:[#allocation2] sm:$0xff]  ;;  %v1054_v1 = vmov 128.0   ;;  %v324_v2 = vld [vmem:[#allocation8 + $0x1e0] sm:$0xff]  ;;  %s1056_s17 = smov [#allocation16]  }
  0x25   :  { %157 = vadd.xlane.f32.xlu0 %v154_v0  ;;  %794 = vrcp.f32 %v1054_v1  ;;  %v325_v3 = vld [vmem:[#allocation8 + $0x1e8] sm:$0xff]  ;;  %v326_v4 = vld [vmem:[#allocation8 + $0x1f0] sm:$0xff]  ;;  %328 = vmatpush.msra.mxu0 %v324_v2  ;;  %v327_v5 = vld [vmem:[#allocation8 + $0x1f8] sm:$0xff]  ;;  %s755_s18 = sshll.u32 %s1056_s17, 4  ;;  %s757_s7 = sshll.u32 %s1208_s11, 4  ;;  %s756_s18 = int_to_ptr.vmem [resolvable:$true] %s755_s18  ;;  %s758_s7 = int_to_ptr.hbm [resolvable:$true] %s757_s7 }
  0x26   :  { %348 = vmatpush.msra.mxu1 %v325_v3  ;;  %v320_v6 = vld [vmem:[#allocation8 + $0x1c0] sm:$0xff]  ;;  %v321_v7 = vld [vmem:[#allocation8 + $0x1c8] sm:$0xff]  ;;  %368 = vmatpush.msra.mxu2 %v326_v4  ;;  %v322_v8 = vld [vmem:[#allocation8 + $0x1d0] sm:$0xff] }
  0x27   :  { %388 = vmatpush.msra.mxu3 %v327_v5  ;;  %v323_v9 = vld [vmem:[#allocation8 + $0x1d8] sm:$0xff]  ;;  %v316_v10 = vld [vmem:[#allocation8 + $0x1a0] sm:$0xff]  ;;  %329 = vmatpush.msra.mxu0 %v320_v6  ;;  %v317_v11 = vld [vmem:[#allocation8 + $0x1a8] sm:$0xff] }
  0x28   :  { %349 = vmatpush.msra.mxu1 %v321_v7  ;;  %v318_v12 = vld [vmem:[#allocation8 + $0x1b0] sm:$0xff]  ;;  %v319_v13 = vld [vmem:[#allocation8 + $0x1b8] sm:$0xff]  ;;  %369 = vmatpush.msra.mxu2 %v322_v8  ;;  %v312_v15 = vld [vmem:[#allocation8 + $0x180] sm:$0xff] }
  0x29   :  { %389 = vmatpush.msra.mxu3 %v323_v9  ;;  %v313_v16 = vld [vmem:[#allocation8 + $0x188] sm:$0xff]  ;;  %330 = vmatpush.msra.mxu0 %v316_v10  ;;  %v314_v17 = vld [vmem:[#allocation8 + $0x190] sm:$0xff]  ;;  %v315_v18 = vld [vmem:[#allocation8 + $0x198] sm:$0xff] }
  0x2a   :  { %350 = vmatpush.msra.mxu1 %v317_v11  ;;  %370 = vmatpush.msra.mxu2 %v318_v12  ;;  %v308_v19 = vld [vmem:[#allocation8 + $0x160] sm:$0xff]  ;;  %v309_v20 = vld [vmem:[#allocation8 + $0x168] sm:$0xff]  ;;  %v310_v22 = vld [vmem:[#allocation8 + $0x170] sm:$0xff] }
  0x2b   :  { %v795_v14 = vpop.eup %794  ;;  %390 = vmatpush.msra.mxu3 %v319_v13  ;;  %331 = vmatpush.msra.mxu0 %v312_v15  ;;  %v311_v23 = vld [vmem:[#allocation8 + $0x178] sm:$0xff]  ;;  %v304_v32 = vld [vmem:[#allocation8 + $0x140] sm:$0xff]  ;;  %v305_v33 = vld [vmem:[#allocation8 + $0x148] sm:$0xff] }
  0x2c   :  { %v160_v21 = vmul.f32 128.0, %v795_v14  ;;  %351 = vmatpush.msra.mxu1 %v313_v16  ;;  %371 = vmatpush.msra.mxu2 %v314_v17  ;;  %vm164_vm0 = vweird.f32 %v795_v14  ;;  %v306_v34 = vld [vmem:[#allocation8 + $0x150] sm:$0xff]  ;;  %v307_v35 = vld [vmem:[#allocation8 + $0x158] sm:$0xff]  ;;  %v300_v36 = vld [vmem:[#allocation8 + $0x120] sm:$0xff] }
  0x2d   :  { %391 = vmatpush.msra.mxu3 %v315_v18  ;;  %332 = vmatpush.msra.mxu0 %v308_v19  ;;  %v301_v37 = vld [vmem:[#allocation8 + $0x128] sm:$0xff]  ;;  %v302_v38 = vld [vmem:[#allocation8 + $0x130] sm:$0xff]  ;;  %v303_v39 = vld [vmem:[#allocation8 + $0x138] sm:$0xff] }
  0x2e   :  { %352 = vmatpush.msra.mxu1 %v309_v20  ;;  %372 = vmatpush.msra.mxu2 %v310_v22  ;;  %v161_v24 = vsub.f32 1.0, %v160_v21  ;;  %v296_v40 = vld [vmem:[#allocation8 + $0x100] sm:$0xff]  ;;  %v297_v41 = vld [vmem:[#allocation8 + $0x108] sm:$0xff]  ;;  %v298_v42 = vld [vmem:[#allocation8 + $0x110] sm:$0xff] }
  0x2f   :  { %392 = vmatpush.msra.mxu3 %v311_v23  ;;  %333 = vmatpush.msra.mxu0 %v304_v32  ;;  %v299_v43 = vld [vmem:[#allocation8 + $0x118] sm:$0xff]  ;;  %v292_v44 = vld [vmem:[#allocation8 + $0xe0] sm:$0xff]  ;;  %v293_v45 = vld [vmem:[#allocation8 + $0xe8] sm:$0xff] }
  0x30   :  { %v162_v25 = vmul.f32 %v795_v14, %v161_v24  ;;  %353 = vmatpush.msra.mxu1 %v305_v33  ;;  %373 = vmatpush.msra.mxu2 %v306_v34  ;;  %v294_v46 = vld [vmem:[#allocation8 + $0xf0] sm:$0xff]  ;;  %v295_v47 = vld [vmem:[#allocation8 + $0xf8] sm:$0xff]  ;;  %v288_v48 = vld [vmem:[#allocation8 + $0xc0] sm:$0xff] }
  0x31   :  { %393 = vmatpush.msra.mxu3 %v307_v35  ;;  %334 = vmatpush.msra.mxu0 %v300_v36  ;;  %v289_v49 = vld [vmem:[#allocation8 + $0xc8] sm:$0xff]  ;;  %v290_v50 = vld [vmem:[#allocation8 + $0xd0] sm:$0xff]  ;;  %v291_v51 = vld [vmem:[#allocation8 + $0xd8] sm:$0xff] }
  0x32   :  { %v163_v26 = vadd.f32 %v795_v14, %v162_v25  ;;  %354 = vmatpush.msra.mxu1 %v301_v37  ;;  %374 = vmatpush.msra.mxu2 %v302_v38  ;;  %v284_v52 = vld [vmem:[#allocation8 + $0xa0] sm:$0xff]  ;;  %v285_v53 = vld [vmem:[#allocation8 + $0xa8] sm:$0xff]  ;;  %v286_v54 = vld [vmem:[#allocation8 + $0xb0] sm:$0xff] }
  0x33   :  { %394 = vmatpush.msra.mxu3 %v303_v39  ;;  %335 = vmatpush.msra.mxu0 %v296_v40  ;;  %v287_v55 = vld [vmem:[#allocation8 + $0xb8] sm:$0xff]  ;;  %v280_v56 = vld [vmem:[#allocation8 + $0x80] sm:$0xff]  ;;  %v281_v57 = vld [vmem:[#allocation8 + $0x88] sm:$0xff] }
  0x34   :  { %v1147_v27 = vsel %vm164_vm0, %v795_v14, %v163_v26  ;;  %355 = vmatpush.msra.mxu1 %v297_v41  ;;  %375 = vmatpush.msra.mxu2 %v298_v42  ;;  %v282_v58 = vld [vmem:[#allocation8 + $0x90] sm:$0xff]  ;;  %v283_v59 = vld [vmem:[#allocation8 + $0x98] sm:$0xff]  ;;  %v276_v60 = vld [vmem:[#allocation8 + $0x60] sm:$0xff] }
  0x35   :  { %395 = vmatpush.msra.mxu3 %v299_v43  ;;  %336 = vmatpush.msra.mxu0 %v292_v44  ;;  %v277_v61 = vld [vmem:[#allocation8 + $0x68] sm:$0xff]  ;;  %v278_v62 = vld [vmem:[#allocation8 + $0x70] sm:$0xff]  ;;  %v279_v63 = vld [vmem:[#allocation8 + $0x78] sm:$0xff] }
  0x36   :  { %356 = vmatpush.msra.mxu1 %v293_v45  ;;  %376 = vmatpush.msra.mxu2 %v294_v46  ;;  %v273_v1 = vld [vmem:[#allocation8 + $0x48] sm:$0xff]  ;;  %v274_v2 = vld [vmem:[#allocation8 + $0x50] sm:$0xff]  ;;  %v275_v3 = vld [vmem:[#allocation8 + $0x58] sm:$0xff] }
  0x37   :  { %396 = vmatpush.msra.mxu3 %v295_v47  ;;  %337 = vmatpush.msra.mxu0 %v288_v48  ;;  %v268_v4 = vld [vmem:[#allocation8 + $0x20] sm:$0xff]  ;;  %v269_v5 = vld [vmem:[#allocation8 + $0x28] sm:$0xff]  ;;  %v270_v6 = vld [vmem:[#allocation8 + $0x30] sm:$0xff] }
  0x38   :  { %357 = vmatpush.msra.mxu1 %v289_v49  ;;  %377 = vmatpush.msra.mxu2 %v290_v50  ;;  %v271_v7 = vld [vmem:[#allocation8 + $0x38] sm:$0xff]  ;;  %v264_v8 = vld [vmem:[#allocation8] sm:$0xff]  ;;  %v265_v9 = vld [vmem:[#allocation8 + $0x8] sm:$0xff] }
  0x39   :  { %397 = vmatpush.msra.mxu3 %v291_v51  ;;  %338 = vmatpush.msra.mxu0 %v284_v52  ;;  %v266_v10 = vld [vmem:[#allocation8 + $0x10] sm:$0xff]  ;;  %v267_v11 = vld [vmem:[#allocation8 + $0x18] sm:$0xff]  ;;  %v260_v12 = vld [vmem:[#allocation10 + $0x1e0] sm:$0xff] }
  0x3a   :  { %358 = vmatpush.msra.mxu1 %v285_v53  ;;  %378 = vmatpush.msra.mxu2 %v286_v54  ;;  %v261_v13 = vld [vmem:[#allocation10 + $0x1e8] sm:$0xff]  ;;  %v262_v14 = vld [vmem:[#allocation10 + $0x1f0] sm:$0xff]  ;;  %v263_v15 = vld [vmem:[#allocation10 + $0x1f8] sm:$0xff] }
  0x3b   :  { %398 = vmatpush.msra.mxu3 %v287_v55  ;;  %339 = vmatpush.msra.mxu0 %v280_v56  ;;  %v256_v16 = vld [vmem:[#allocation10 + $0x1c0] sm:$0xff]  ;;  %v257_v17 = vld [vmem:[#allocation10 + $0x1c8] sm:$0xff]  ;;  %v258_v18 = vld [vmem:[#allocation10 + $0x1d0] sm:$0xff] }
  0x3c   :  { %359 = vmatpush.msra.mxu1 %v281_v57  ;;  %379 = vmatpush.msra.mxu2 %v282_v58  ;;  %v259_v19 = vld [vmem:[#allocation10 + $0x1d8] sm:$0xff]  ;;  %v252_v20 = vld [vmem:[#allocation10 + $0x1a0] sm:$0xff]  ;;  %v253_v21 = vld [vmem:[#allocation10 + $0x1a8] sm:$0xff] }
  0x3d   :  { %399 = vmatpush.msra.mxu3 %v283_v59  ;;  %340 = vmatpush.msra.mxu0 %v276_v60  ;;  %v254_v22 = vld [vmem:[#allocation10 + $0x1b0] sm:$0xff]  ;;  %v255_v23 = vld [vmem:[#allocation10 + $0x1b8] sm:$0xff]  ;;  %v248_v24 = vld [vmem:[#allocation10 + $0x180] sm:$0xff] }
  0x3e   :  { %360 = vmatpush.msra.mxu1 %v277_v61  ;;  %380 = vmatpush.msra.mxu2 %v278_v62  ;;  %v249_v25 = vld [vmem:[#allocation10 + $0x188] sm:$0xff]  ;;  %v250_v26 = vld [vmem:[#allocation10 + $0x190] sm:$0xff]  ;;  %v247_v33 = vld [vmem:[#allocation10 + $0x178] sm:$0xff] }
  0x3f   :  { %400 = vmatpush.msra.mxu3 %v279_v63  ;;  %v246_v32 = vld [vmem:[#allocation10 + $0x170] sm:$0xff]  ;;  %v240_v34 = vld [vmem:[#allocation10 + $0x140] sm:$0xff]  ;;  %v241_v35 = vld [vmem:[#allocation10 + $0x148] sm:$0xff] }
  0x40   :  { %361 = vmatpush.msra.mxu1 %v273_v1  ;;  %381 = vmatpush.msra.mxu2 %v274_v2  ;;  %v242_v36 = vld [vmem:[#allocation10 + $0x150] sm:$0xff]  ;;  %v243_v37 = vld [vmem:[#allocation10 + $0x158] sm:$0xff]  ;;  %v236_v39 = vld [vmem:[#allocation10 + $0x120] sm:$0xff] }
  0x41   :  { %401 = vmatpush.msra.mxu3 %v275_v3  ;;  %v237_v40 = vld [vmem:[#allocation10 + $0x128] sm:$0xff]  ;;  %v238_v42 = vld [vmem:[#allocation10 + $0x130] sm:$0xff]  ;;  %v239_v43 = vld [vmem:[#allocation10 + $0x138] sm:$0xff] }
  0x42   :  { %362 = vmatpush.msra.mxu1 %v269_v5  ;;  %382 = vmatpush.msra.mxu2 %v270_v6  ;;  %v232_v44 = vld [vmem:[#allocation10 + $0x100] sm:$0xff]  ;;  %v233_v45 = vld [vmem:[#allocation10 + $0x108] sm:$0xff]  ;;  %v234_v47 = vld [vmem:[#allocation10 + $0x110] sm:$0xff] }
  0x43   :  { %402 = vmatpush.msra.mxu3 %v271_v7  ;;  %v235_v48 = vld [vmem:[#allocation10 + $0x118] sm:$0xff]  ;;  %v228_v49 = vld [vmem:[#allocation10 + $0xe0] sm:$0xff]  ;;  %v229_v50 = vld [vmem:[#allocation10 + $0xe8] sm:$0xff] }
  0x44   :  { %363 = vmatpush.msra.mxu1 %v265_v9  ;;  %383 = vmatpush.msra.mxu2 %v266_v10  ;;  %v231_v51 = vld [vmem:[#allocation10 + $0xf8] sm:$0xff]  ;;  %v224_v52 = vld [vmem:[#allocation10 + $0xc0] sm:$0xff]  ;;  %v225_v53 = vld [vmem:[#allocation10 + $0xc8] sm:$0xff] }
  0x45   :  { %403 = vmatpush.msra.mxu3 %v267_v11  ;;  %v226_v54 = vld [vmem:[#allocation10 + $0xd0] sm:$0xff]  ;;  %v227_v55 = vld [vmem:[#allocation10 + $0xd8] sm:$0xff]  ;;  %v220_v56 = vld [vmem:[#allocation10 + $0xa0] sm:$0xff] }
  0x46   :  { %428 = vmatpush.msrb.mxu1 %v261_v13  ;;  %448 = vmatpush.msrb.mxu2 %v262_v14  ;;  %v221_v57 = vld [vmem:[#allocation10 + $0xa8] sm:$0xff]  ;;  %v222_v58 = vld [vmem:[#allocation10 + $0xb0] sm:$0xff]  ;;  %v223_v59 = vld [vmem:[#allocation10 + $0xb8] sm:$0xff] }
  0x47   :  { %468 = vmatpush.msrb.mxu3 %v263_v15  ;;  %v216_v60 = vld [vmem:[#allocation10 + $0x80] sm:$0xff]  ;;  %v217_v61 = vld [vmem:[#allocation10 + $0x88] sm:$0xff]  ;;  %v218_v63 = vld [vmem:[#allocation10 + $0x90] sm:$0xff] }
  0x48   :  { %429 = vmatpush.msrb.mxu1 %v257_v17  ;;  %449 = vmatpush.msrb.mxu2 %v258_v18  ;;  %v212_v3 = vld [vmem:[#allocation10 + $0x60] sm:$0xff]  ;;  %v214_v5 = vld [vmem:[#allocation10 + $0x70] sm:$0xff]  ;;  %v215_v6 = vld [vmem:[#allocation10 + $0x78] sm:$0xff] }
  0x49   :  { %469 = vmatpush.msrb.mxu3 %v259_v19  ;;  %v208_v7 = vld [vmem:[#allocation10 + $0x40] sm:$0xff]  ;;  %v210_v10 = vld [vmem:[#allocation10 + $0x50] sm:$0xff]  ;;  %v211_v11 = vld [vmem:[#allocation10 + $0x58] sm:$0xff] }
  0x4a   :  { %430 = vmatpush.msrb.mxu1 %v253_v21  ;;  %450 = vmatpush.msrb.mxu2 %v254_v22  ;;  %v205_v13 = vld [vmem:[#allocation10 + $0x28] sm:$0xff]  ;;  %v206_v14 = vld [vmem:[#allocation10 + $0x30] sm:$0xff]  ;;  %v207_v15 = vld [vmem:[#allocation10 + $0x38] sm:$0xff] }
  0x4b   :  { %470 = vmatpush.msrb.mxu3 %v255_v23  ;;  %v200_v17 = vld [vmem:[#allocation10] sm:$0xff]  ;;  %v201_v18 = vld [vmem:[#allocation10 + $0x8] sm:$0xff]  ;;  %v202_v19 = vld [vmem:[#allocation10 + $0x10] sm:$0xff] }
  0x4c   :  { %431 = vmatpush.msrb.mxu1 %v249_v25  ;;  %451 = vmatpush.msrb.mxu2 %v250_v26  ;;  %v791_v22 = vld [vmem:[%s1199_s2] ss:$0 sm:$0xff]  ;;  %v792_v25 = vld [vmem:[#allocation7] ss:$0 sm:$0xff] }
  0x4e   :  { %452 = vmatpush.msrb.mxu2 %v246_v32 }
  0x50   :  { %453 = vmatpush.msrb.mxu2 %v242_v36  ;;  %v199_v36 = vld [vmem:[#allocation5] sm:$0xff] }
  0x52   :  { %454 = vmatpush.msrb.mxu2 %v238_v42 }
  0x54   :  { %455 = vmatpush.msrb.mxu2 %v234_v47 }
  0x98   :  { %v158_v28 = vpop.xlane.xlu0 %157 }
  0x99   :  { %v166_v29 = vmul.f32 %v1147_v27, %v158_v28  ;;  %v251_v28 = vld [vmem:[#allocation10 + $0x198] sm:$0xff] }
  0x9a   :  { %471 = vmatpush.msrb.mxu3 %v251_v28 }
  0x9b   :  { %v1150_v30 = vsub.f32 %v154_v0, %v166_v29  ;;  %v272_v0 = vld [vmem:[#allocation8 + $0x40] sm:$0xff] }
  0x9c   :  { %341 = vmatpush.msra.mxu0 %v272_v0  ;;  %v244_v29 = vld [vmem:[#allocation10 + $0x160] sm:$0xff]  ;;  %472 = vmatpush.msrb.mxu3 %v247_v33  ;;  %v219_v0 = vld [vmem:[#allocation10 + $0x98] sm:$0xff] }
  0x9d   :  { %v168_v31 = vmul.f32 %v1150_v30, %v1150_v30 }
  0x9e   :  { %342 = vmatpush.msra.mxu0 %v268_v4  ;;  %473 = vmatpush.msrb.mxu3 %v243_v37  ;;  %v213_v4 = vld [vmem:[#allocation10 + $0x68] sm:$0xff] }
  0x9f   :  { %169 = vadd.xlane.f32.xlu0 %v168_v31  ;;  %v245_v31 = vld [vmem:[#allocation10 + $0x168] sm:$0xff] }
  0xa0   :  { %343 = vmatpush.msra.mxu0 %v264_v8  ;;  %432 = vmatpush.msrb.mxu1 %v245_v31  ;;  %v209_v8 = vld [vmem:[#allocation10 + $0x48] sm:$0xff] }
  0xa1   :  { %474 = vmatpush.msrb.mxu3 %v239_v43 }
  0xa2   :  { %408 = vmatpush.msrb.mxu0 %v260_v12  ;;  %433 = vmatpush.msrb.mxu1 %v241_v35  ;;  %v204_v12 = vld [vmem:[#allocation10 + $0x20] sm:$0xff] }
  0xa3   :  { %475 = vmatpush.msrb.mxu3 %v235_v48 }
  0xa4   :  { %409 = vmatpush.msrb.mxu0 %v256_v16  ;;  %434 = vmatpush.msrb.mxu1 %v237_v40  ;;  %v488_v40 = vld [vmem:[%s1203_s6] sm:$0xf] }
  0xa5   :  { %476 = vmatpush.msrb.mxu3 %v231_v51 }
  0xa6   :  { %410 = vmatpush.msrb.mxu0 %v252_v20  ;;  %435 = vmatpush.msrb.mxu1 %v233_v45  ;;  %v203_v20 = vld [vmem:[#allocation10 + $0x18] sm:$0xff] }
  0xa7   :  { %477 = vmatpush.msrb.mxu3 %v227_v55 }
  0xa8   :  { %411 = vmatpush.msrb.mxu0 %v248_v24  ;;  %436 = vmatpush.msrb.mxu1 %v229_v50 }
  0xa9   :  { %478 = vmatpush.msrb.mxu3 %v223_v59  ;;  %v1055_v59 = vmov 512.0  }
  0xaa   :  { %412 = vmatpush.msrb.mxu0 %v244_v29  ;;  %437 = vmatpush.msrb.mxu1 %v225_v53  ;;  %v493_v53 = vperm.slane %v488_v40, 3 }
  0xab   :  { %479 = vmatpush.msrb.mxu3 %v219_v0 }
  0xac   :  { %413 = vmatpush.msrb.mxu0 %v240_v34  ;;  %438 = vmatpush.msrb.mxu1 %v221_v57 }
  0xad   :  { %480 = vmatpush.msrb.mxu3 %v215_v6 }
  0xae   :  { %414 = vmatpush.msrb.mxu0 %v236_v39  ;;  %439 = vmatpush.msrb.mxu1 %v217_v61 }
  0xaf   :  { %481 = vmatpush.msrb.mxu3 %v211_v11 }
  0xb0   :  { %415 = vmatpush.msrb.mxu0 %v232_v44  ;;  %440 = vmatpush.msrb.mxu1 %v213_v4  ;;  %v490_v44 = vperm.slane %v488_v40, 0 }
  0xb1   :  { %482 = vmatpush.msrb.mxu3 %v207_v15  ;;  %v615_v15 = vld [vmem:[#allocation14 + $0x78] sm:$0xff] }
  0xb2   :  { %416 = vmatpush.msrb.mxu0 %v228_v49  ;;  %441 = vmatpush.msrb.mxu1 %v209_v8  ;;  %v492_v49 = vperm.slane %v488_v40, 2 }
  0xb3   :  { %483 = vmatpush.msrb.mxu3 %v203_v20  ;;  %v630_v20 = vld [vmem:[#allocation14 + $0xf0] sm:$0xff] }
  0xb4   :  { %417 = vmatpush.msrb.mxu0 %v224_v52  ;;  %442 = vmatpush.msrb.mxu1 %v205_v13 }
  0xb6   :  { %418 = vmatpush.msrb.mxu0 %v220_v56  ;;  %443 = vmatpush.msrb.mxu1 %v201_v18  ;;  %v663_v18 = vld [vmem:[#allocation14 + $0x1f8] sm:$0xff] }
  0xb8   :  { %419 = vmatpush.msrb.mxu0 %v216_v60 }
  0xba   :  { %420 = vmatpush.msrb.mxu0 %v212_v3 }
  0xbc   :  { %421 = vmatpush.msrb.mxu0 %v208_v7 }
  0xbe   :  { %422 = vmatpush.msrb.mxu0 %v204_v12 }
  0xc0   :  { %423 = vmatpush.msrb.mxu0 %v200_v17  ;;  %v647_v17 = vld [vmem:[#allocation14 + $0x178] sm:$0xff] }
 0x112   :  { %v170_v38 = vpop.xlane.xlu0 %169 }
 0x113   :  { %v171_v41 = vmul.f32 %v170_v38, %v1147_v27  ;;  %v230_v27 = vld [vmem:[#allocation10 + $0xf0] sm:$0xff] }
 0x114   :  { %456 = vmatpush.msrb.mxu2 %v230_v27 }
 0x115   :  { %v1155_v46 = vadd.f32 1e-05, %v171_v41 }
 0x116   :  { %457 = vmatpush.msrb.mxu2 %v226_v54 }
 0x117   :  { %796 = vrsqrt.f32 %v1155_v46  ;;  %vm179_vm2 = vweird.f32 %v1155_v46 }
 0x118   :  { %458 = vmatpush.msrb.mxu2 %v222_v58 }
 0x11a   :  { %459 = vmatpush.msrb.mxu2 %v218_v63 }
 0x11c   :  { %460 = vmatpush.msrb.mxu2 %v214_v5 }
 0x11d   :  { %v797_v62 = vpop.eup %796 }
 0x11e   :  { %v174_v1 = vmul.f32 %v797_v62, %v1155_v46  ;;  %vm180_vm1 = vweird.f32 %v797_v62  ;;  %461 = vmatpush.msrb.mxu2 %v210_v10  ;;  %v491_v46 = vperm.slane %v488_v40, 1  ;;  %v609_v40 = vld [vmem:[#allocation14 + $0x48] sm:$0xff] }
 0x11f   :  { %vm181_vm3 = vmor %vm179_vm2, %vm180_vm1 }
 0x120   :  { %v175_v2 = vmul.f32 %v797_v62, %v174_v1  ;;  %462 = vmatpush.msrb.mxu2 %v206_v14 }
 0x122   :  { %v176_v9 = vmul.f32 0.5, %v175_v2  ;;  %463 = vmatpush.msrb.mxu2 %v202_v19  ;;  %v614_v19 = vld [vmem:[#allocation14 + $0x70] sm:$0xff] }
 0x124   :  { %v177_v16 = vsub.f32 1.5, %v176_v9 }
 0x126   :  { %v178_v21 = vmul.f32 %v797_v62, %v177_v16  ;;  %v631_v16 = vld [vmem:[#allocation14 + $0xf8] sm:$0xff] }
 0x128   :  { %v182_v23 = vsel %vm181_vm3, %v797_v62, %v178_v21  ;;  %v646_v21 = vld [vmem:[#allocation14 + $0x170] sm:$0xff] }
 0x129   :  { %v183_v24 = vmul.f32 %v182_v23, %v1150_v30  ;;  %v613_v23 = vld [vmem:[#allocation14 + $0x68] sm:$0xff] }
 0x12b   :  { %v187_v26 = vmul.f32 %v791_v22, %v183_v24  ;;  %v662_v22 = vld [vmem:[#allocation14 + $0x1f0] sm:$0xff]  ;;  %v629_v24 = vld [vmem:[#allocation14 + $0xe8] sm:$0xff] }
 0x12d   :  { %v191_v28 = vadd.f32 %v792_v25, %v187_v26  ;;  %v645_v25 = vld [vmem:[#allocation14 + $0x168] sm:$0xff] }
 0x12e   :  { %v661_v26 = vld [vmem:[#allocation14 + $0x1e8] sm:$0xff] }
 0x12f   :  { %v193_v29 = vmul.f32 1.442695, %v191_v28  ;;  %vm192_vm4 = vcmp.gt.f32.partialorder %v191_v28, 0.0 }
 0x131   :  { %798 = vpow2.f32 %v193_v29  ;;  %v628_v29 = vld [vmem:[#allocation14 + $0xe0] sm:$0xff] }
 0x132   :  { %800 = vrcp.f32 %v1055_v59  ;;  %v653_v59 = vld [vmem:[#allocation14 + $0x1a8] sm:$0xff] }
 0x137   :  { %v799_v31 = vpop.eup %798 }
 0x138   :  { %v771_v32 = vadd.f32 -1.0, %v799_v31  ;;  %v801_v60 = vpop.eup %800  ;;  %v644_v31 = vld [vmem:[#allocation14 + $0x160] sm:$0xff] }
 0x139   :  { %v510_v61 = vmul.f32 512.0, %v801_v60  ;;  %vm514_vm5 = vweird.f32 %v801_v60 }
 0x13a   :  { %v196_v33 = vmul.f32 1.6732632, %v771_v32  ;;  %v660_v32 = vld [vmem:[#allocation14 + $0x1e0] sm:$0xff] }
 0x13b   :  { %v511_v62 = vsub.f32 1.0, %v510_v61  ;;  %v604_v61 = vld [vmem:[#allocation14 + $0x20] sm:$0xff] }
 0x13c   :  { %v197_v34 = vsel %vm192_vm4, %v191_v28, %v196_v33  ;;  %v612_v28 = vld [vmem:[#allocation14 + $0x60] sm:$0xff]  ;;  %v611_v33 = vld [vmem:[#allocation14 + $0x58] sm:$0xff] }
 0x13d   :  { %v198_v35 = vmul.f32 1.050701, %v197_v34  ;;  %v512_v63 = vmul.f32 %v801_v60, %v511_v62  ;;  %v627_v34 = vld [vmem:[#allocation14 + $0xd8] sm:$0xff]  ;;  %v620_v62 = vld [vmem:[#allocation14 + $0xa0] sm:$0xff] }
 0x13f   :  { %344 = vmatmul.f32.vlgmr.msra.gmra.mxu0 %v198_v35  ;;  %364 = vmatmul.f32.vlgmr.msra.gmra.mxu1 %v198_v35  ;;  %v513_v0 = vadd.f32 %v801_v60, %v512_v63  ;;  %v636_v63 = vld [vmem:[#allocation14 + $0x120] sm:$0xff] }
 0x140   :  { %384 = vmatmul.f32.vlgmr.msra.gmra.mxu2 %v198_v35  ;;  %404 = vmatmul.f32.vlgmr.msra.gmra.mxu3 %v198_v35  ;;  %v643_v35 = vld [vmem:[#allocation14 + $0x158] sm:$0xff] }
 0x141   :  { %v1167_v1 = vsel %vm514_vm5, %v801_v60, %v513_v0  ;;  %668 = vmatpush.msra.mxu0 %v615_v15  ;;  %688 = vmatpush.msra.mxu1 %v631_v16  ;;  %v652_v0 = vld [vmem:[#allocation14 + $0x1a0] sm:$0xff]  ;;  %v617_v15 = vld [vmem:[#allocation14 + $0x88] sm:$0xff] }
 0x142   :  { %708 = vmatpush.msra.mxu2 %v647_v17  ;;  %728 = vmatpush.msra.mxu3 %v663_v18  ;;  %v633_v16 = vld [vmem:[#allocation14 + $0x108] sm:$0xff]  ;;  %v600_v18 = vld [vmem:[#allocation14] sm:$0xff] }
 0x143   :  { %669 = vmatpush.msra.mxu0 %v614_v19  ;;  %689 = vmatpush.msra.mxu1 %v630_v20  ;;  %v649_v17 = vld [vmem:[#allocation14 + $0x188] sm:$0xff]  ;;  %v616_v19 = vld [vmem:[#allocation14 + $0x80] sm:$0xff] }
 0x144   :  { %709 = vmatpush.msra.mxu2 %v646_v21  ;;  %729 = vmatpush.msra.mxu3 %v662_v22  ;;  %v632_v20 = vld [vmem:[#allocation14 + $0x100] sm:$0xff] }
 0x145   :  { %670 = vmatpush.msra.mxu0 %v613_v23  ;;  %690 = vmatpush.msra.mxu1 %v629_v24  ;;  %v648_v21 = vld [vmem:[#allocation14 + $0x180] sm:$0xff] }
 0x146   :  { %710 = vmatpush.msra.mxu2 %v645_v25  ;;  %730 = vmatpush.msra.mxu3 %v661_v26  ;;  %v502_v26 = vld [vmem:[#allocation11] sm:$0xf] }
 0x147   :  { %424 = vmatmul.f32.vlgmr.msrb.gmra.mxu0 %v199_v36  ;;  %444 = vmatmul.f32.vlgmr.msrb.gmra.mxu1 %v199_v36 }
 0x148   :  { %464 = vmatmul.f32.vlgmr.msrb.gmra.mxu2 %v199_v36  ;;  %484 = vmatmul.f32.vlgmr.msrb.gmra.mxu3 %v199_v36  ;;  %v659_v36 = vld [vmem:[#allocation14 + $0x1d8] sm:$0xff] }
 0x149   :  { %671 = vmatpush.msra.mxu0 %v612_v28  ;;  %691 = vmatpush.msra.mxu1 %v628_v29  ;;  %v503_v29 = vld [vmem:[#allocation13] sm:$0xf] }
 0x14a   :  { %711 = vmatpush.msra.mxu2 %v644_v31  ;;  %731 = vmatpush.msra.mxu3 %v660_v32  ;;  %v547_v32 = vperm.slane %v502_v26, 0 }
 0x14b   :  { %672 = vmatpush.msra.mxu0 %v611_v33  ;;  %692 = vmatpush.msra.mxu1 %v627_v34  ;;  %v560_v33 = vperm.slane %v503_v29, 0  ;;  %v548_v34 = vperm.slane %v502_v26, 1 }
 0x14c   :  { %712 = vmatpush.msra.mxu2 %v643_v35  ;;  %732 = vmatpush.msra.mxu3 %v659_v36  ;;  %v549_v35 = vperm.slane %v502_v26, 2  ;;  %v550_v36 = vperm.slane %v502_v26, 3 }
 0x1bc   :  { %v345_v30 = vpop.f32.mrf.mxu0  ;;  %v365_v37 = vpop.f32.mrf.mxu1 }
 0x1c3   :  { %v385_v38 = vpop.f32.mrf.mxu2  ;;  %v405_v39 = vpop.f32.mrf.mxu3 }
 0x1c4   :  { %v425_v41 = vpop.f32.mrf.mxu0  ;;  %v445_v42 = vpop.f32.mrf.mxu1 }
 0x1c5   :  { %v426_v43 = vadd.f32 %v425_v41, %v345_v30  ;;  %v446_v45 = vadd.f32 %v445_v42, %v365_v37  ;;  %v610_v30 = vld [vmem:[#allocation14 + $0x50] sm:$0xff]  ;;  %v625_v41 = vld [vmem:[#allocation14 + $0xc8] sm:$0xff] }
 0x1c6   :  { %v626_v37 = vld [vmem:[#allocation14 + $0xd0] sm:$0xff]  ;;  %673 = vmatpush.msra.mxu0 %v610_v30  ;;  %v641_v42 = vld [vmem:[#allocation14 + $0x148] sm:$0xff] }
 0x1c7   :  { %v498_v47 = vadd.f32 %v490_v44, %v426_v43  ;;  %v499_v48 = vadd.f32 %v491_v46, %v446_v45  ;;  %693 = vmatpush.msra.mxu1 %v626_v37  ;;  %v657_v43 = vld [vmem:[#allocation14 + $0x1c8] sm:$0xff]  ;;  %v608_v44 = vld [vmem:[#allocation14 + $0x40] sm:$0xff]  ;;  %v561_v37 = vperm.slane %v503_v29, 1 }
 0x1c8   :  { %674 = vmatpush.msra.mxu0 %v609_v40  ;;  %v624_v45 = vld [vmem:[#allocation14 + $0xc0] sm:$0xff] }
 0x1c9   :  { %v504_v55 = vadd.f32 %v499_v48, %v498_v47  ;;  %694 = vmatpush.msra.mxu1 %v625_v41  ;;  %v640_v46 = vld [vmem:[#allocation14 + $0x140] sm:$0xff] }
 0x1ca   :  { %675 = vmatpush.msra.mxu0 %v608_v44 }
 0x1cb   :  { %v465_v50 = vpop.f32.mrf.mxu2  ;;  %v485_v27 = vpop.f32.mrf.mxu3  ;;  %695 = vmatpush.msra.mxu1 %v624_v45 }
 0x1cc   :  { %v466_v51 = vadd.f32 %v465_v50, %v385_v38  ;;  %v486_v52 = vadd.f32 %v485_v27, %v405_v39  ;;  %v642_v38 = vld [vmem:[#allocation14 + $0x150] sm:$0xff]  ;;  %v639_v50 = vld [vmem:[#allocation14 + $0x138] sm:$0xff] }
 0x1cd   :  { %v658_v39 = vld [vmem:[#allocation14 + $0x1d0] sm:$0xff]  ;;  %713 = vmatpush.msra.mxu2 %v642_v38  ;;  %v655_v27 = vld [vmem:[#allocation14 + $0x1b8] sm:$0xff]  ;;  %v562_v38 = vperm.slane %v503_v29, 2 }
 0x1ce   :  { %v500_v54 = vadd.f32 %v492_v49, %v466_v51  ;;  %v501_v56 = vadd.f32 %v493_v53, %v486_v52  ;;  %733 = vmatpush.msra.mxu3 %v658_v39  ;;  %v623_v49 = vld [vmem:[#allocation14 + $0xb8] sm:$0xff]  ;;  %v606_v51 = vld [vmem:[#allocation14 + $0x30] sm:$0xff]  ;;  %v563_v39 = vperm.slane %v503_v29, 3 }
 0x1cf   :  { %714 = vmatpush.msra.mxu2 %v641_v42  ;;  %v622_v52 = vld [vmem:[#allocation14 + $0xb0] sm:$0xff]  ;;  %696 = vmatpush.msra.mxu1 %v623_v49 }
 0x1d0   :  { %v505_v57 = vadd.f32 %v504_v55, %v500_v54  ;;  %734 = vmatpush.msra.mxu3 %v657_v43  ;;  %v638_v53 = vld [vmem:[#allocation14 + $0x130] sm:$0xff]  ;;  %v605_v55 = vld [vmem:[#allocation14 + $0x28] sm:$0xff] }
 0x1d1   :  { %715 = vmatpush.msra.mxu2 %v640_v46  ;;  %697 = vmatpush.msra.mxu1 %v622_v52 }
 0x1d2   :  { %v506_v58 = vadd.f32 %v505_v57, %v501_v56 }
 0x1d3   :  { %716 = vmatpush.msra.mxu2 %v639_v50 }
 0x1d4   :  { %507 = vadd.xlane.f32.xlu1 %v506_v58  ;;  %v637_v58 = vld [vmem:[#allocation14 + $0x128] sm:$0xff] }
 0x1d5   :  { %717 = vmatpush.msra.mxu2 %v638_v53 }
 0x1d7   :  { %718 = vmatpush.msra.mxu2 %v637_v58 }
 0x1d9   :  { %719 = vmatpush.msra.mxu2 %v636_v63 }
 0x247   :  { %v508_v2 = vpop.xlane.xlu1 %507 }
 0x248   :  { %v516_v3 = vmul.f32 %v1167_v1, %v508_v2 }
 0x24a   :  { %v1170_v4 = vsub.f32 %v498_v47, %v516_v3  ;;  %v1172_v5 = vsub.f32 %v499_v48, %v516_v3  ;;  %v1174_v6 = vsub.f32 %v500_v54, %v516_v3  ;;  %v1176_v7 = vsub.f32 %v501_v56, %v516_v3  ;;  %v656_v47 = vld [vmem:[#allocation14 + $0x1c0] sm:$0xff]  ;;  %v607_v48 = vld [vmem:[#allocation14 + $0x38] sm:$0xff]  ;;  %v654_v54 = vld [vmem:[#allocation14 + $0x1b0] sm:$0xff] }
 0x24b   :  { %735 = vmatpush.msra.mxu3 %v656_v47  ;;  %676 = vmatpush.msra.mxu0 %v607_v48  ;;  %v621_v56 = vld [vmem:[#allocation14 + $0xa8] sm:$0xff]  ;;  %v603_v3 = vld [vmem:[#allocation14 + $0x18] sm:$0xff] }
 0x24c   :  { %v521_v8 = vmul.f32 %v1170_v4, %v1170_v4  ;;  %v522_v9 = vmul.f32 %v1172_v5, %v1172_v5  ;;  %v523_v10 = vmul.f32 %v1174_v6, %v1174_v6  ;;  %v524_v12 = vmul.f32 %v1176_v7, %v1176_v7  ;;  %698 = vmatpush.msra.mxu1 %v621_v56 }
 0x24d   :  { %736 = vmatpush.msra.mxu3 %v655_v27  ;;  %677 = vmatpush.msra.mxu0 %v606_v51 }
 0x24e   :  { %v525_v11 = vadd.f32 %v522_v9, %v521_v8  ;;  %v619_v8 = vld [vmem:[#allocation14 + $0x98] sm:$0xff]  ;;  %699 = vmatpush.msra.mxu1 %v620_v62 }
 0x24f   :  { %737 = vmatpush.msra.mxu3 %v654_v54  ;;  %678 = vmatpush.msra.mxu0 %v605_v55  ;;  %v635_v9 = vld [vmem:[#allocation14 + $0x118] sm:$0xff] }
 0x250   :  { %v526_v13 = vadd.f32 %v525_v11, %v523_v10  ;;  %v651_v10 = vld [vmem:[#allocation14 + $0x198] sm:$0xff]  ;;  %v618_v11 = vld [vmem:[#allocation14 + $0x90] sm:$0xff]  ;;  %700 = vmatpush.msra.mxu1 %v619_v8  ;;  %720 = vmatpush.msra.mxu2 %v635_v9 }
 0x251   :  { %738 = vmatpush.msra.mxu3 %v653_v59  ;;  %679 = vmatpush.msra.mxu0 %v604_v61 }
 0x252   :  { %v527_v14 = vadd.f32 %v526_v13, %v524_v12  ;;  %v634_v12 = vld [vmem:[#allocation14 + $0x110] sm:$0xff]  ;;  %701 = vmatpush.msra.mxu1 %v618_v11  ;;  %v793_v11 = vld [vmem:[%s1207_s10] ss:$0 sm:$0xff] }
 0x253   :  { %739 = vmatpush.msra.mxu3 %v652_v0  ;;  %680 = vmatpush.msra.mxu0 %v603_v3  ;;  %v650_v13 = vld [vmem:[#allocation14 + $0x190] sm:$0xff] }
 0x254   :  { %528 = vadd.xlane.f32.xlu1 %v527_v14  ;;  %v601_v14 = vld [vmem:[#allocation14 + $0x8] sm:$0xff]  ;;  %721 = vmatpush.msra.mxu2 %v634_v12 }
 0x255   :  { %740 = vmatpush.msra.mxu3 %v651_v10  ;;  %702 = vmatpush.msra.mxu1 %v617_v15 }
 0x256   :  { %722 = vmatpush.msra.mxu2 %v633_v16 }
 0x257   :  { %741 = vmatpush.msra.mxu3 %v650_v13  ;;  %703 = vmatpush.msra.mxu1 %v616_v19 }
 0x258   :  { %723 = vmatpush.msra.mxu2 %v632_v20 }
 0x259   :  { %742 = vmatpush.msra.mxu3 %v649_v17 }
 0x25b   :  { %743 = vmatpush.msra.mxu3 %v648_v21 }
 0x2c7   :  { %v529_v57 = vpop.xlane.xlu1 %528 }
 0x2c8   :  { %v530_v60 = vmul.f32 %v529_v57, %v1167_v1  ;;  %v602_v1 = vld [vmem:[#allocation14 + $0x10] sm:$0xff] }
 0x2c9   :  { %681 = vmatpush.msra.mxu0 %v602_v1 }
 0x2ca   :  { %v531_v2 = vadd.f32 1e-05, %v530_v60 }
 0x2cb   :  { %682 = vmatpush.msra.mxu0 %v601_v14 }
 0x2cc   :  { %802 = vrsqrt.f32 %v531_v2  ;;  %vm538_vm7 = vweird.f32 %v531_v2 }
 0x2cd   :  { %683 = vmatpush.msra.mxu0 %v600_v18 }
 0x2d2   :  { %v803_v22 = vpop.eup %802 }
 0x2d3   :  { %v533_v23 = vmul.f32 %v803_v22, %v531_v2  ;;  %vm539_vm6 = vweird.f32 %v803_v22 }
 0x2d4   :  { %vm540_vm8 = vmor %vm538_vm7, %vm539_vm6 }
 0x2d5   :  { %v534_v24 = vmul.f32 %v803_v22, %v533_v23 }
 0x2d7   :  { %v535_v25 = vmul.f32 0.5, %v534_v24 }
 0x2d9   :  { %v536_v28 = vsub.f32 1.5, %v535_v25 }
 0x2db   :  { %v537_v31 = vmul.f32 %v803_v22, %v536_v28 }
 0x2dd   :  { %v541_v30 = vsel %vm540_vm8, %v803_v22, %v537_v31 }
 0x2de   :  { %v542_v40 = vmul.f32 %v541_v30, %v1170_v4  ;;  %v543_v41 = vmul.f32 %v541_v30, %v1172_v5  ;;  %v544_v42 = vmul.f32 %v541_v30, %v1174_v6  ;;  %v545_v43 = vmul.f32 %v541_v30, %v1176_v7 }
 0x2e0   :  { %v555_v44 = vmul.f32 %v547_v32, %v542_v40  ;;  %v556_v45 = vmul.f32 %v548_v34, %v543_v41  ;;  %v557_v46 = vmul.f32 %v549_v35, %v544_v42  ;;  %v558_v47 = vmul.f32 %v550_v36, %v545_v43 }
 0x2e2   :  { %v568_v48 = vadd.f32 %v560_v33, %v555_v44  ;;  %v569_v49 = vadd.f32 %v561_v37, %v556_v45  ;;  %v570_v50 = vadd.f32 %v562_v38, %v557_v46  ;;  %v571_v27 = vadd.f32 %v563_v39, %v558_v47 }
 0x2e4   :  { %v576_v51 = vmul.f32 1.442695, %v568_v48  ;;  %v578_v52 = vmul.f32 1.442695, %v569_v49  ;;  %v580_v53 = vmul.f32 1.442695, %v570_v50 }
 0x2e5   :  { %v582_v54 = vmul.f32 1.442695, %v571_v27  ;;  %vm572_vm9 = vcmp.gt.f32.partialorder %v568_v48, 0.0  ;;  %vm573_vm10 = vcmp.gt.f32.partialorder %v569_v49, 0.0  ;;  %vm574_vm11 = vcmp.gt.f32.partialorder %v570_v50, 0.0 }
 0x2e6   :  { %804 = vpow2.f32 %v576_v51  ;;  %vm575_vm12 = vcmp.gt.f32.partialorder %v571_v27, 0.0 }
 0x2e7   :  { %806 = vpow2.f32 %v578_v52 }
 0x2e8   :  { %808 = vpow2.f32 %v580_v53 }
 0x2e9   :  { %810 = vpow2.f32 %v582_v54 }
 0x2ec   :  { %v805_v4 = vpop.eup %804 }
 0x2ed   :  { %v807_v5 = vpop.eup %806  ;;  %v772_v6 = vadd.f32 -1.0, %v805_v4 }
 0x2ee   :  { %v809_v7 = vpop.eup %808  ;;  %v773_v55 = vadd.f32 -1.0, %v807_v5 }
 0x2ef   :  { %v811_v56 = vpop.eup %810  ;;  %v588_v57 = vmul.f32 1.6732632, %v772_v6  ;;  %v774_v58 = vadd.f32 -1.0, %v809_v7 }
 0x2f0   :  { %v589_v59 = vmul.f32 1.6732632, %v773_v55  ;;  %v775_v60 = vadd.f32 -1.0, %v811_v56 }
 0x2f1   :  { %v592_v61 = vsel %vm572_vm9, %v568_v48, %v588_v57  ;;  %v590_v62 = vmul.f32 1.6732632, %v774_v58 }
 0x2f2   :  { %v596_v63 = vmul.f32 1.050701, %v592_v61  ;;  %v593_v0 = vsel %vm573_vm10, %v569_v49, %v589_v59  ;;  %v591_v2 = vmul.f32 1.6732632, %v775_v60 }
 0x2f3   :  { %v597_v3 = vmul.f32 1.050701, %v593_v0  ;;  %v594_v8 = vsel %vm574_vm11, %v570_v50, %v590_v62 }
 0x2f4   :  { %684 = vmatmul.f32.vlgmr.msra.gmra.mxu0 %v596_v63  ;;  %v598_v9 = vmul.f32 1.050701, %v594_v8  ;;  %v595_v10 = vsel %vm575_vm12, %v571_v27, %v591_v2 }
 0x2f5   :  { %704 = vmatmul.f32.vlgmr.msra.gmra.mxu1 %v597_v3  ;;  %v599_v1 = vmul.f32 1.050701, %v595_v10 }
 0x2f6   :  { %724 = vmatmul.f32.vlgmr.msra.gmra.mxu2 %v598_v9 }
 0x2f7   :  { %744 = vmatmul.f32.vlgmr.msra.gmra.mxu3 %v599_v1 }
 0x371   :  { %v685_v12 = vpop.f32.mrf.mxu0 }
 0x372   :  { %v686_v13 = vadd.f32 %v793_v11, %v685_v12  ;;  %v705_v14 = vpop.f32.mrf.mxu1 }
 0x374   :  { %v706_v15 = vadd.f32 %v705_v14, %v686_v13 }
 0x379   :  { %v725_v16 = vpop.f32.mrf.mxu2 }
 0x37a   :  { %v726_v17 = vadd.f32 %v725_v16, %v706_v15  ;;  %v745_v18 = vpop.f32.mrf.mxu3 }
 0x37c   :  { %v746_v19 = vadd.f32 %v745_v18, %v726_v17 }
 0x37e   :  { %812 = vtanh.f32 %v746_v19 }
 0x384   :  { %v813_v20 = vpop.eup %812 }
 0x385   :  { %749 = vst [vmem:[#allocation16] sm:$0xff] %v813_v20 }
 0x386   :  { %760 = dma.vmem_to_hbm [thread:$0]  %s756_s18, 128, %s758_s7, [#allocation4]  }
 0x387   :  { %1040 = dma.done.wait [#allocation4], 128  }
 0x388   :  { %1041 = vsyncadd [#allocation4], 4294967168 }
 0x389   :  { %765 = vsyncpa [#allocation3], 1 }
 0x38a   :  { %766 = vsyncpa [#allocation6], 1 }
 0x38b   :  { %767 = vsyncpa [#allocation9], 1 }
 0x38c   :  { %768 = vsyncpa [#allocation12], 1 }
 0x38d   :  { %769 = vsyncpa [#allocation15], 1 }
 0x38e   :  { %770 = vsyncpa [#allocation4], 1 }

</bundles_post_ra>
